<compile_context>
chip_gen: v5e
topology: v5e:2x2
jax: 0.10.0
libtpu: 0.0.40
codegen_flags: <defaults>
</compile_context>

<pallas_src>
import functools

import numpy as np
import jax
import jax.numpy as jnp
from jax.experimental import pallas as pl
from jax.experimental.pallas import tpu as pltpu


_VMEM_LIMIT_BYTES = 48 * 1024 * 1024   # explicit scoped-VMEM ceiling (v5e/v6e/v7x safe)
_INPUT_VMEM_BUDGET = 36 * 1024 * 1024  # budget for double-buffered row-tiled operands


def _sublane_multiple(*dtypes):
    # f32 tiles pack (8,128) rows, bf16 (16,128), int8/fp8 (32,128).
    return max(max(8, 32 // jnp.dtype(d).itemsize) for d in dtypes)


def _choose_row_block(n_rows, bytes_per_row, sublane):
    """Largest row block whose double-buffered working set fits the VMEM budget."""
    max_rows = max(sublane, _INPUT_VMEM_BUDGET // (2 * max(bytes_per_row, 1)))
    if n_rows <= max_rows:
        return n_rows  # single block == full array dims (no (8,128) constraint)
    return max((max_rows // sublane) * sublane, sublane)


def _pad_rows(x, rows_padded):
    if x.shape[0] == rows_padded:
        return x
    # TODO(synk): padding copies the slab; realistic DINO batches divide the
    # row block evenly so this path is a rare fallback.
    return jnp.pad(x, ((0, rows_padded - x.shape[0]), (0, 0)))


# --------------------------------------------------------------------------
# Kernel 1: fused DINO cross-entropy for one (student, teacher) view pair.
#   per_row = sum_d teacher * log_softmax(student / T)
#   loss    = -(1/B) * sum_rows per_row
# Each grid step handles one row chunk and writes its partial sum broadcast
# into its own lane-dense (8,128) output tile (independent -> "parallel").
# --------------------------------------------------------------------------
def _dino_pair_loss_kernel(s_ref, t_ref, out_ref, *, inv_temp):
    # Native-dtype DMA; upcast in-register (f32 math everywhere, incl. v5e).
    s = s_ref[...].astype(jnp.float32) * inv_temp                 # (tb, D)
    t = t_ref[...].astype(jnp.float32)                            # (tb, D)

    m = jnp.max(s, axis=-1, keepdims=True)                        # XLU lane reduce
    lse = m + jnp.log(jnp.sum(jnp.exp(s - m), axis=-1, keepdims=True))  # EUP exp/log

    # sum_d t*(s - lse) == sum_d t*s - lse * sum_d t   (exact algebra; avoids
    # materializing the (tb, D) log-softmax tile and a second full-tile pass).
    row_dot = jnp.sum(t * s, axis=-1, keepdims=True)              # (tb, 1)
    row_tmass = jnp.sum(t, axis=-1, keepdims=True)                # (tb, 1); 0 for padded rows
    partial = jnp.sum(row_dot - lse * row_tmass)                  # chunk partial (scalar)

    out_ref[...] = jnp.full(out_ref.shape, partial, dtype=out_ref.dtype)


def dino_pair_loss(student, teacher, *, student_temp):
    """student/teacher: (B, D) arrays (any float dtype). Returns scalar loss term."""
    B, D = student.shape
    bytes_per_row = D * (student.dtype.itemsize + teacher.dtype.itemsize)
    sub = _sublane_multiple(student.dtype, teacher.dtype)
    tb = _choose_row_block(B, bytes_per_row, sub)
    nchunks = int(pl.cdiv(B, tb))
    rows_p = nchunks * tb
    student = _pad_rows(student, rows_p)
    teacher = _pad_rows(teacher, rows_p)

    kernel = functools.partial(_dino_pair_loss_kernel,
                               inv_temp=float(1.0 / student_temp))
    partials = pl.pallas_call(
        kernel,
        out_shape=jax.ShapeDtypeStruct((nchunks * 8, 128), jnp.float32),
        grid=(nchunks,),
        in_specs=[
            pl.BlockSpec((tb, D), lambda i: (i, 0)),
            pl.BlockSpec((tb, D), lambda i: (i, 0)),
        ],
        out_specs=pl.BlockSpec((8, 128), lambda i: (i, 0)),
        compiler_params=pltpu.CompilerParams(
            dimension_semantics=("parallel",),
            vmem_limit_bytes=_VMEM_LIMIT_BYTES),
    )(student, teacher)

    # One partial per chunk (each (8,128) tile holds the same broadcast value).
    return -jnp.sum(partials[::8, 0]) * (1.0 / B)


# --------------------------------------------------------------------------
# Kernel 2: softmax_center_teacher
#   softmax((teacher_output - center) / teacher_temp, axis=-1), row-tiled.
# --------------------------------------------------------------------------
def _softmax_center_kernel(t_ref, c_ref, o_ref, *, inv_temp):
    x = (t_ref[...].astype(jnp.float32) - c_ref[...].astype(jnp.float32)) * inv_temp
    m = jnp.max(x, axis=-1, keepdims=True)
    e = jnp.exp(x - m)
    denom = jnp.sum(e, axis=-1, keepdims=True)
    # Exact reciprocal keeps tight numerics vs. the reference softmax;
    # approx=True would map to the EUP vrcp slot if precision can be relaxed.
    o_ref[...] = (e * pl.reciprocal(denom, approx=False)).astype(o_ref.dtype)


def softmax_center_teacher_pallas(teacher_output, center, teacher_temp):
    B, D = teacher_output.shape
    bytes_per_row = D * (teacher_output.dtype.itemsize * 2)   # input tile + output tile
    sub = _sublane_multiple(teacher_output.dtype)
    tb = _choose_row_block(B, bytes_per_row, sub)
    nchunks = int(pl.cdiv(B, tb))
    rows_p = nchunks * tb
    teacher_p = _pad_rows(teacher_output, rows_p)

    kernel = functools.partial(_softmax_center_kernel,
                               inv_temp=float(1.0 / teacher_temp))
    out = pl.pallas_call(
        kernel,
        out_shape=jax.ShapeDtypeStruct((rows_p, D), teacher_output.dtype),
        grid=(nchunks,),
        in_specs=[
            pl.BlockSpec((tb, D), lambda i: (i, 0)),
            pl.BlockSpec((1, D), lambda i: (0, 0)),   # center reused across chunks
        ],
        out_specs=pl.BlockSpec((tb, D), lambda i: (i, 0)),
        compiler_params=pltpu.CompilerParams(
            dimension_semantics=("parallel",),
            vmem_limit_bytes=_VMEM_LIMIT_BYTES),
    )(teacher_p, center.astype(jnp.float32))
    return out[:B]


# --------------------------------------------------------------------------
# DINOLoss module (JAX / Pallas port of the PyTorch reference)
# --------------------------------------------------------------------------
class DINOLoss:
    def __init__(self, out_dim, student_temp=0.1, center_momentum=0.9):
        self.student_temp = student_temp
        self.center_momentum = center_momentum
        self.center = jnp.zeros((1, out_dim), dtype=jnp.float32)   # buffer
        self.updated = True
        self.reduce_handle = None
        self.len_teacher_output = None
        self.async_batch_center = None

    # ---- teacher post-processing -----------------------------------------
    def softmax_center_teacher(self, teacher_output, teacher_temp):
        self.apply_center_update()
        return softmax_center_teacher_pallas(teacher_output, self.center,
                                             teacher_temp)

    def sinkhorn_knopp_teacher(self, teacher_output, teacher_temp,
                               n_iterations=3):
        # TODO(synk): iterative data-dependent global row/col renormalization
        # is kept in plain JAX; no Pallas win for this tiny op.
        Q = jnp.exp(teacher_output.astype(jnp.float32) / teacher_temp).T
        B = Q.shape[1]
        K = Q.shape[0]
        Q = Q / jnp.sum(Q)
        for _ in range(n_iterations):
            Q = Q / jnp.sum(Q, axis=1, keepdims=True)
            Q = Q / K
            Q = Q / jnp.sum(Q, axis=0, keepdims=True)
            Q = Q / B
        Q = Q * B
        return Q.T

    # ---- forward -----------------------------------------------------------
    def forward(self, student_output_list, teacher_out_softmaxed_centered_list):
        pairs = list(zip(student_output_list,
                         teacher_out_softmaxed_centered_list))
        if not pairs:
            return jnp.float32(0.0)
        # One fused pallas_call per view pair: zero extra HBM copies (no
        # concatenate, no wrapper upcasts); kernel-dispatch overhead is
        # negligible vs. the bandwidth-bound slab traffic at realistic sizes.
        total = jnp.float32(0.0)
        for s, t in pairs:
            total = total + dino_pair_loss(s, t, student_temp=self.student_temp)
        return total

    __call__ = forward

    # ---- center bookkeeping (tiny; plain JAX) ------------------------------
    def update_center(self, teacher_output):
        self.reduce_center_update(teacher_output)

    def reduce_center_update(self, teacher_output):
        # TODO(synk): distributed all-reduce of the batch center is a no-op
        # here (single host); only the local sum is kept, matching the math.
        self.updated = False
        self.len_teacher_output = teacher_output.shape[0]
        self.async_batch_center = jnp.sum(teacher_output.astype(jnp.float32),
                                          axis=0, keepdims=True)

    def apply_center_update(self):
        if not self.updated:
            _t = self.async_batch_center / self.len_teacher_output
            self.center = (self.center * self.center_momentum
                           + _t * (1.0 - self.center_momentum))
            self.updated = True


# --------------------------------------------------------------------------
if __name__ == "__main__":
    out_dim, batch, n_views = 128, 8, 2
    teacher_temp = 0.04

    key = jax.random.PRNGKey(0)
    keys = jax.random.split(key, 1 + n_views)
    teacher_logits = jax.random.normal(keys[0], (batch, out_dim),
                                       dtype=jnp.float32)
    student_list = [jax.random.normal(keys[1 + v], (batch, out_dim),
                                      dtype=jnp.float32)
                    for v in range(n_views)]

    loss_mod = DINOLoss(out_dim)

    # Exercise the center-update path, then the teacher softmax kernel.
    loss_mod.update_center(teacher_logits)
    t_soft = loss_mod.softmax_center_teacher(teacher_logits, teacher_temp)
    teacher_list = [t_soft for _ in range(n_views)]

    # Forward (fused Pallas loss kernels, one per view pair).
    loss = loss_mod.forward(student_list, teacher_list)
    jax.block_until_ready(loss)

    # Pure-JAX reference checks.
    def ref_forward(s_list, t_list, temp):
        total = 0.0
        for s, t in zip(s_list, t_list):
            lsm = jax.nn.log_softmax(s / temp, axis=-1)
            total = total - jnp.sum(t * lsm, axis=-1).mean()
        return total

    ref_loss = ref_forward(student_list, teacher_list, loss_mod.student_temp)
    np.testing.assert_allclose(np.asarray(loss), np.asarray(ref_loss),
                               rtol=1e-4, atol=1e-4)

    ref_t = jax.nn.softmax((teacher_logits - loss_mod.center) / teacher_temp,
                           axis=-1)
    np.testing.assert_allclose(np.asarray(t_soft), np.asarray(ref_t),
                               rtol=1e-4, atol=1e-5)

    print("KERNEL_OK")
</pallas_src>

<mosaic_0001>
module attributes {stable_mosaic.version = 11 : i64} {
  func.func @_softmax_center_kernel(%arg0: i32, %arg1: memref<8x128xf32, #tpu.memory_space<vmem>>, %arg2: memref<1x128xf32, #tpu.memory_space<vmem>>, %arg3: memref<8x128xf32, #tpu.memory_space<vmem>>) attributes {dimension_semantics = [#tpu.dimension_semantics<parallel>], iteration_bounds = array<i64: 1>, scalar_prefetch = 0 : i64, scratch_operands = 0 : i64, tpu.core_type = #tpu.core_type<tc>, window_params = [{transform_indices = @transform_0, window_bounds = array<i64: 8, 128>}, {pipeline_mode = #tpu.pipeline_mode<synchronous>, transform_indices = @transform_1, window_bounds = array<i64: 1, 128>}, {transform_indices = @transform_2, window_bounds = array<i64: 8, 128>}]} {
    %c0 = arith.constant 0 : index
    %c0_0 = arith.constant 0 : index
    %0 = vector.load %arg1[%c0, %c0_0] : memref<8x128xf32, #tpu.memory_space<vmem>>, vector<8x128xf32>
    %c0_1 = arith.constant 0 : index
    %c0_2 = arith.constant 0 : index
    %1 = vector.load %arg2[%c0_1, %c0_2] : memref<1x128xf32, #tpu.memory_space<vmem>>, vector<1x128xf32>
    %2 = vector.broadcast %1 : vector<1x128xf32> to vector<8x128xf32>
    %3 = arith.subf %0, %2 : vector<8x128xf32>
    %cst = arith.constant 2.500000e+01 : f32
    %4 = vector.broadcast %cst : f32 to vector<8x128xf32>
    %5 = arith.mulf %3, %4 : vector<8x128xf32>
    %cst_3 = arith.constant dense<0xFF800000> : vector<8xf32>
    %6 = vector.multi_reduction <maximumf>, %5, %cst_3 [1] : vector<8x128xf32> to vector<8xf32>
    %7 = vector.shape_cast %6 : vector<8xf32> to vector<8x1xf32>
    %8 = vector.broadcast %7 : vector<8x1xf32> to vector<8x128xf32>
    %9 = arith.subf %5, %8 : vector<8x128xf32>
    %10 = math.exp %9 : vector<8x128xf32>
    %cst_4 = arith.constant dense<0.000000e+00> : vector<8xf32>
    %11 = vector.multi_reduction <add>, %10, %cst_4 [1] : vector<8x128xf32> to vector<8xf32>
    %12 = vector.shape_cast %11 : vector<8xf32> to vector<8x1xf32>
    %13 = tpu.reciprocal %12 : vector<8x1xf32> -> vector<8x1xf32>
    %14 = vector.broadcast %13 : vector<8x1xf32> to vector<8x128xf32>
    %15 = arith.mulf %10, %14 : vector<8x128xf32>
    %c0_5 = arith.constant 0 : index
    %c0_6 = arith.constant 0 : index
    %16 = vector.load %arg3[%c0_5, %c0_6] : memref<8x128xf32, #tpu.memory_space<vmem>>, vector<8x128xf32>
    tpu.vector_store %arg3[%c0_5, %c0_6], %15 {strides = array<i32>} : memref<8x128xf32, #tpu.memory_space<vmem>>, vector<8x128xf32>,
    return
  }
  func.func @transform_0(%arg0: i32) -> (i32, i32) {
    %c0_i32 = arith.constant 0 : i32
    %c0_i32_0 = arith.constant 0 : i32
    return %arg0, %c0_i32 : i32, i32
  }
  func.func @transform_1(%arg0: i32) -> (i32, i32) {
    %c0_i32 = arith.constant 0 : i32
    %c0_i32_0 = arith.constant 0 : i32
    %c0_i32_1 = arith.constant 0 : i32
    return %c0_i32, %c0_i32_0 : i32, i32
  }
  func.func @transform_2(%arg0: i32) -> (i32, i32) {
    %c0_i32 = arith.constant 0 : i32
    %c0_i32_0 = arith.constant 0 : i32
    return %arg0, %c0_i32 : i32, i32
  }
}

</mosaic_0001>

<bundles_post_ra>
// kernel: tpu_custom_call.1
= control target key start
LH: loop header
LB: loop body
LE: loop exit
PB: predicated region body
PF: predicated region fallthrough
CT: control target
= control target key end

     0   :  { %7 = vsyncpa [#allocation3], 0  ;;  %s201_s0 = inlined_call_operand.hbm [shape: f32[8,128], index: 0, kind: input, shape index: {}]   ;;  %s202_s1 = inlined_call_operand.hbm [shape: f32[1,128], index: 1, kind: input, shape index: {}]   ;;  %s203_s2 = inlined_call_operand.hbm [shape: f32[8,128], index: 2, kind: output, shape index: {}]  }
   0x1   :  { %8 = vsyncpa [#allocation6], 0 }
   0x2   :  { %9 = vsyncpa [#allocation4], 0  ;;  %s15_s11 = sshll.u32 %s201_s0, 4  ;;  %s174_s12 = smov [#allocation2]   ;;  %s16_s11 = int_to_ptr.hbm [resolvable:$true] %s15_s11 }
   0x3   :  { %s17_s13 = sshll.u32 %s174_s12, 4  ;;  %s26_s16 = sshll.u32 %s202_s1, 4  ;;  %s18_s13 = int_to_ptr.vmem [resolvable:$true] %s17_s13  ;;  %s27_s16 = int_to_ptr.hbm [resolvable:$true] %s26_s16 }
   0x4   :  { %20 = dma.hbm_to_vmem [thread:$0]  %s16_s11, 128, %s18_s13, [#allocation3]  }
   0x5   :  { %s175_s17 = smov [#allocation5]  }
   0x6   :  { %s28_s18 = sshll.u32 %s175_s17, 4  ;;  %s29_s18 = int_to_ptr.vmem [resolvable:$true] %s28_s18 }
   0x7   :  { %31 = dma.hbm_to_vmem [thread:$0]  %s27_s16, 16, %s29_s18, [#allocation6]  }
   0x8   :  { %168 = dma.done.wait [#allocation3], 128  }
   0x9   :  { %169 = vsyncadd [#allocation3], 4294967168 }
   0xa   :  { %170 = dma.done.wait [#allocation6], 16  }
   0xb   :  { %171 = vsyncadd [#allocation6], 4294967280  ;;  %v40_v0 = vld [vmem:[#allocation2] sm:$0xff]  ;;  %v91_v1 = vld [vmem:[#allocation5] ss:$0 sm:$0xff]  ;;  %s176_s0 = smov [#allocation7]  }
   0xc   :  { %v45_v2 = vsub.f32 %v40_v0, %v91_v1  ;;  %s75_s1 = sshll.u32 %s176_s0, 4  ;;  %s77_s21 = sshll.u32 %s203_s2, 4  ;;  %s76_s1 = int_to_ptr.vmem [resolvable:$true] %s75_s1  ;;  %s78_s21 = int_to_ptr.hbm [resolvable:$true] %s77_s21 }
   0xe   :  { %v46_v3 = vmul.f32 25.0, %v45_v2 }
  0x10   :  { %47 = vmax.xlane.f32.xlu0 %v46_v3 }
  0x83   :  { %v48_v4 = vpop.xlane.xlu0 %47 }
  0x84   :  { %v49_v5 = vsub.f32 %v46_v3, %v48_v4 }
  0x86   :  { %v50_v6 = vmul.f32 1.442695, %v49_v5 }
  0x88   :  { %92 = vpow2.f32 %v50_v6 }
  0x8e   :  { %v93_v7 = vpop.eup %92 }
  0x8f   :  { %52 = vadd.xlane.f32.xlu0 %v93_v7 }
 0x102   :  { %v53_v8 = vpop.xlane.xlu0 %52 }
 0x103   :  { %94 = vrcp.f32 %v53_v8  ;;  %v65_v12 = vand.u32 2147483648, %v53_v8  ;;  %v63_v14 = vand.u32 2147483647, %v53_v8  ;;  %vm59_vm1 = vweird.f32 %v53_v8 }
 0x105   :  { %v66_v16 = vor.u32 1.1754944e-38, %v65_v12  ;;  %vm64_vm3 = vcmp.eq.f32.partialorder %v63_v14, 8.507059e+37 }
 0x109   :  { %v95_v9 = vpop.eup %94 }
 0x10a   :  { %v55_v10 = vmul.f32 %v95_v9, %v53_v8  ;;  %vm60_vm0 = vweird.f32 %v95_v9 }
 0x10b   :  { %vm61_vm2 = vmor %vm59_vm1, %vm60_vm0 }
 0x10c   :  { %v56_v11 = vsub.f32 1.0, %v55_v10 }
 0x10e   :  { %v57_v13 = vmul.f32 %v95_v9, %v56_v11 }
 0x110   :  { %v58_v15 = vadd.f32 %v95_v9, %v57_v13 }
 0x112   :  { %v62_v17 = vsel %vm61_vm2, %v95_v9, %v58_v15 }
 0x113   :  { %v67_v18 = vsel %vm64_vm3, %v66_v16, %v62_v17 }
 0x114   :  { %v68_v19 = vmul.f32 %v93_v7, %v67_v18 }
 0x116   :  { %69 = vst [vmem:[#allocation7] sm:$0xff] %v68_v19 }
 0x117   :  { %80 = dma.vmem_to_hbm [thread:$0]  %s76_s1, 128, %s78_s21, [#allocation4]  }
 0x118   :  { %172 = dma.done.wait [#allocation4], 128  }
 0x119   :  { %173 = vsyncadd [#allocation4], 4294967168 }
 0x11a   :  { %85 = vsyncpa [#allocation3], 1 }
 0x11b   :  { %86 = vsyncpa [#allocation6], 1 }
 0x11c   :  { %87 = vsyncpa [#allocation4], 1 }

</bundles_post_ra>
